<compile_context>
chip_gen: v6e
topology: v6e:2x2x1
jax: 0.10.0
libtpu: 0.0.40
codegen_flags: <defaults>
</compile_context>

<pallas_src>
import functools

import numpy as np

import jax
import jax.numpy as jnp
from jax import lax
from jax.experimental import pallas as pl
from jax.experimental.pallas import tpu as pltpu


def _conv_bn_act_kernel(xp_ref, w_ref, b_ref, out_ref, patch_ref, *,
                        L, C_in, K, Wp, act):
    """One batch element: KxK conv as ONE k=K*K*C_in matmul + bias + SiLU.

    xp_ref    : (1, C_in, Sp)       bf16 zero-padded flat pixels (lanes)
    w_ref     : (C_out, K*K*C_in)   bf16 weights, BN scale folded in
    b_ref     : (C_out, 1)          f32 folded BN shift (+ conv bias)
    out_ref   : (1, C_out, L)       f32 output, pixels on lanes (NCHW-flat)
    patch_ref : (K*K*C_in, L)       bf16 VMEM scratch: im2col patches
    """
    # In-kernel im2col: stack the K*K shifted lane-windows along the sublane
    # (channel) axis.  Contiguous copies, no masks, no lane shuffles.
    for ki in range(K):
        for kj in range(K):
            t = ki * K + kj
            off = ki * Wp + kj                                  # static offset
            patch_ref[t * C_in:(t + 1) * C_in, :] = xp_ref[0, :, off:off + L]

    # Single MXU matmul, f32 accumulation.
    acc = jnp.dot(w_ref[...], patch_ref[...],
                  preferred_element_type=jnp.float32)           # (C_out, L)
    acc = acc + b_ref[...]                                      # per-channel bias
    if act:
        acc = acc * jax.nn.sigmoid(acc)                         # SiLU (EUP)
    out_ref[0] = acc.astype(out_ref.dtype)


def conv_bn_act(x_nchw, w_oihw, conv_bias=None, bn=None, *,
                stride=1, padding=0, act=True, eps=1e-5):
    """PyTorch ConvBatchNormAct forward (eval mode), NCHW in / NCHW out."""
    N, C_in, H, W = x_nchw.shape
    C_out, C_in_w, K, K2 = w_oihw.shape
    assert K == K2 and C_in_w == C_in          # TODO(synk): groups > 1 unsupported
    assert padding <= (K - 1) // 2             # TODO(synk): over-padding unsupported

    # ---- fold BatchNorm (inference) and conv bias into scale / shift -------
    if bn is not None:
        gamma, beta, mean, var = bn
        scale = gamma * lax.rsqrt(var + eps)
        shift = beta - mean * scale
    else:
        scale = jnp.ones((C_out,), jnp.float32)
        shift = jnp.zeros((C_out,), jnp.float32)
    if conv_bias is not None:
        shift = shift + scale * conv_bias

    # Weights -> (C_out, K*K*C_in), BN scale folded in, bf16 for the MXU.
    # Column ordering (tap-major, channel-minor) matches the im2col stacking.
    w2d = (jnp.transpose(w_oihw, (0, 2, 3, 1)).reshape(C_out, K * K * C_in)
           * scale[:, None]).astype(jnp.bfloat16)
    b_col = shift.reshape(C_out, 1).astype(jnp.float32)

    # ---- zero-padded, flattened pixel axis (channels stay on sublanes) -----
    # Flat row stride Wp = W + K - 1 (K-1 zero cols per row) + top/bottom halo
    # (+1 spare row for the last tap's overrun) => every shifted window valid.
    Wp = W + (K - 1)
    Hp = H + K
    xpad = jnp.pad(x_nchw.astype(jnp.bfloat16),
                   ((0, 0), (0, 0),
                    (padding, Hp - H - padding),
                    (padding, Wp - W - padding)))
    xflat = xpad.reshape(N, C_in, Hp * Wp)        # free (contiguous) reshape

    L = H * Wp                                    # output flat length / image
    kernel = functools.partial(_conv_bn_act_kernel,
                               L=L, C_in=C_in, K=K, Wp=Wp, act=act)

    out_flat = pl.pallas_call(
        kernel,
        out_shape=jax.ShapeDtypeStruct((N, C_out, L), jnp.float32),
        grid=(N,),
        in_specs=[
            pl.BlockSpec((1, C_in, Hp * Wp), lambda n: (n, 0, 0)),
            pl.BlockSpec((C_out, K * K * C_in), lambda n: (0, 0)),
            pl.BlockSpec((C_out, 1), lambda n: (0, 0)),
        ],
        out_specs=pl.BlockSpec((1, C_out, L), lambda n: (n, 0, 0)),
        scratch_shapes=[pltpu.VMEM((K * K * C_in, L), jnp.bfloat16)],
        compiler_params=pltpu.CompilerParams(
            dimension_semantics=("parallel",)),   # v7x: one image per core
    )(xflat, w2d, b_col)

    # Drop the K-1 junk columns per row; layout is already NCHW (no transpose).
    out = out_flat.reshape(N, C_out, H, Wp)[:, :, :, :W]

    # valid-padding / stride: subsample the stride-1 same-grid result.
    Ho = (H + 2 * padding - K) // stride + 1
    Wo = (W + 2 * padding - K) // stride + 1
    if (Ho, Wo) != (H, W) or stride != 1:
        out = out[:, :, :(Ho - 1) * stride + 1:stride,
                  :(Wo - 1) * stride + 1:stride]
    return out


def conv_bn_act_reference(x, w, conv_bias=None, bn=None, *, stride=1,
                          padding=0, act=True, eps=1e-5):
    """Pure-JAX reference matching the PyTorch module in eval mode."""
    y = lax.conv_general_dilated(
        x, w, (stride, stride), [(padding, padding), (padding, padding)],
        dimension_numbers=('NCHW', 'OIHW', 'NCHW'), precision='highest')
    if conv_bias is not None:
        y = y + conv_bias.reshape(1, -1, 1, 1)
    if bn is not None:
        gamma, beta, mean, var = (a.reshape(1, -1, 1, 1) for a in bn)
        y = gamma * (y - mean) * lax.rsqrt(var + eps) + beta
    if act:
        y = y * jax.nn.sigmoid(y)
    return y


if __name__ == "__main__":
    key = jax.random.PRNGKey(0)
    ks = jax.random.split(key, 8)

    # ---- Config A: ConvBatchNormAct(16, 128, kernel_size=3, stride=1,
    #                                 padding=1, bias=False, bn=True, act=True)
    N, C_in, H, W = 2, 16, 16, 16
    C_out, K, stride, padding = 128, 3, 1, 1
    x = jax.random.normal(ks[0], (N, C_in, H, W), dtype=jnp.float32)
    w = (jax.random.normal(ks[1], (C_out, C_in, K, K), dtype=jnp.float32)
         / np.sqrt(C_in * K * K)).astype(jnp.float32)
    gamma = jax.random.uniform(ks[2], (C_out,), minval=0.5, maxval=1.5)
    beta = 0.1 * jax.random.normal(ks[3], (C_out,))
    mean = 0.1 * jax.random.normal(ks[4], (C_out,))
    var = jax.random.uniform(ks[5], (C_out,), minval=0.5, maxval=1.5)
    bn = (gamma, beta, mean, var)

    out_a = conv_bn_act(x, w, None, bn, stride=stride, padding=padding, act=True)
    jax.block_until_ready(out_a)
    ref_a = conv_bn_act_reference(x, w, None, bn, stride=stride,
                                  padding=padding, act=True)
    err_a = float(jnp.max(jnp.abs(out_a - ref_a)))
    assert err_a < 5e-2, f"config A max abs error vs reference: {err_a}"

    # ---- Config B: ConvBatchNormAct(16, 32, kernel_size=1, padding=0,
    #                                 bias=True, bn=False, act=False)
    C_out_b = 32
    w_b = (jax.random.normal(ks[6], (C_out_b, C_in, 1, 1), dtype=jnp.float32)
           / np.sqrt(C_in)).astype(jnp.float32)
    bias_b = 0.1 * jax.random.normal(ks[7], (C_out_b,))

    out_b = conv_bn_act(x, w_b, bias_b, None, stride=1, padding=0, act=False)
    jax.block_until_ready(out_b)
    ref_b = conv_bn_act_reference(x, w_b, bias_b, None, stride=1, padding=0,
                                  act=False)
    err_b = float(jnp.max(jnp.abs(out_b - ref_b)))
    assert err_b < 5e-2, f"config B max abs error vs reference: {err_b}"

    print("KERNEL_OK")
</pallas_src>

<mosaic_0001>
module attributes {stable_mosaic.version = 11 : i64} {
  func.func @_conv_bn_act_kernel(%arg0: i32, %arg1: memref<1x16x342xbf16, #tpu.memory_space<vmem>>, %arg2: memref<128x144xbf16, #tpu.memory_space<vmem>>, %arg3: memref<128x1xf32, #tpu.memory_space<vmem>>, %arg4: memref<1x128x288xf32, #tpu.memory_space<vmem>>, %arg5: memref<144x288xbf16, #tpu.memory_space<vmem>>) attributes {dimension_semantics = [#tpu.dimension_semantics<parallel>], iteration_bounds = array<i64: 2>, scalar_prefetch = 0 : i64, scratch_operands = 1 : i64, tpu.core_type = #tpu.core_type<tc>, window_params = [{transform_indices = @transform_0, window_bounds = array<i64: 1, 16, 342>}, {pipeline_mode = #tpu.pipeline_mode<synchronous>, transform_indices = @transform_1, window_bounds = array<i64: 128, 144>}, {pipeline_mode = #tpu.pipeline_mode<synchronous>, transform_indices = @transform_2, window_bounds = array<i64: 128, 1>}, {transform_indices = @transform_3, window_bounds = array<i64: 1, 128, 288>}]} {
    %c0 = arith.constant 0 : index
    %c0_0 = arith.constant 0 : index
    %c0_1 = arith.constant 0 : index
    %0 = vector.load %arg1[%c0, %c0_0, %c0_1] : memref<1x16x342xbf16, #tpu.memory_space<vmem>>, vector<1x16x288xbf16>
    %1 = vector.shape_cast %0 : vector<1x16x288xbf16> to vector<16x288xbf16>
    %c0_2 = arith.constant 0 : index
    %c0_3 = arith.constant 0 : index
    %2 = vector.load %arg5[%c0_2, %c0_3] : memref<144x288xbf16, #tpu.memory_space<vmem>>, vector<16x288xbf16>
    tpu.vector_store %arg5[%c0_2, %c0_3], %1 {strides = array<i32>} : memref<144x288xbf16, #tpu.memory_space<vmem>>, vector<16x288xbf16>,
    %c0_4 = arith.constant 0 : index
    %c0_5 = arith.constant 0 : index
    %c1 = arith.constant 1 : index
    %3 = vector.load %arg1[%c0_4, %c0_5, %c1] : memref<1x16x342xbf16, #tpu.memory_space<vmem>>, vector<1x16x288xbf16>
    %4 = vector.shape_cast %3 : vector<1x16x288xbf16> to vector<16x288xbf16>
    %c16 = arith.constant 16 : index
    %c0_6 = arith.constant 0 : index
    %5 = vector.load %arg5[%c16, %c0_6] : memref<144x288xbf16, #tpu.memory_space<vmem>>, vector<16x288xbf16>
    tpu.vector_store %arg5[%c16, %c0_6], %4 {strides = array<i32>} : memref<144x288xbf16, #tpu.memory_space<vmem>>, vector<16x288xbf16>,
    %c0_7 = arith.constant 0 : index
    %c0_8 = arith.constant 0 : index
    %c2 = arith.constant 2 : index
    %6 = vector.load %arg1[%c0_7, %c0_8, %c2] : memref<1x16x342xbf16, #tpu.memory_space<vmem>>, vector<1x16x288xbf16>
    %7 = vector.shape_cast %6 : vector<1x16x288xbf16> to vector<16x288xbf16>
    %c32 = arith.constant 32 : index
    %c0_9 = arith.constant 0 : index
    %8 = vector.load %arg5[%c32, %c0_9] : memref<144x288xbf16, #tpu.memory_space<vmem>>, vector<16x288xbf16>
    tpu.vector_store %arg5[%c32, %c0_9], %7 {strides = array<i32>} : memref<144x288xbf16, #tpu.memory_space<vmem>>, vector<16x288xbf16>,
    %c0_10 = arith.constant 0 : index
    %c0_11 = arith.constant 0 : index
    %c18 = arith.constant 18 : index
    %9 = vector.load %arg1[%c0_10, %c0_11, %c18] : memref<1x16x342xbf16, #tpu.memory_space<vmem>>, vector<1x16x288xbf16>
    %10 = vector.shape_cast %9 : vector<1x16x288xbf16> to vector<16x288xbf16>
    %c48 = arith.constant 48 : index
    %c0_12 = arith.constant 0 : index
    %11 = vector.load %arg5[%c48, %c0_12] : memref<144x288xbf16, #tpu.memory_space<vmem>>, vector<16x288xbf16>
    tpu.vector_store %arg5[%c48, %c0_12], %10 {strides = array<i32>} : memref<144x288xbf16, #tpu.memory_space<vmem>>, vector<16x288xbf16>,
    %c0_13 = arith.constant 0 : index
    %c0_14 = arith.constant 0 : index
    %c19 = arith.constant 19 : index
    %12 = vector.load %arg1[%c0_13, %c0_14, %c19] : memref<1x16x342xbf16, #tpu.memory_space<vmem>>, vector<1x16x288xbf16>
    %13 = vector.shape_cast %12 : vector<1x16x288xbf16> to vector<16x288xbf16>
    %c64 = arith.constant 64 : index
    %c0_15 = arith.constant 0 : index
    %14 = vector.load %arg5[%c64, %c0_15] : memref<144x288xbf16, #tpu.memory_space<vmem>>, vector<16x288xbf16>
    tpu.vector_store %arg5[%c64, %c0_15], %13 {strides = array<i32>} : memref<144x288xbf16, #tpu.memory_space<vmem>>, vector<16x288xbf16>,
    %c0_16 = arith.constant 0 : index
    %c0_17 = arith.constant 0 : index
    %c20 = arith.constant 20 : index
    %15 = vector.load %arg1[%c0_16, %c0_17, %c20] : memref<1x16x342xbf16, #tpu.memory_space<vmem>>, vector<1x16x288xbf16>
    %16 = vector.shape_cast %15 : vector<1x16x288xbf16> to vector<16x288xbf16>
    %c80 = arith.constant 80 : index
    %c0_18 = arith.constant 0 : index
    %17 = vector.load %arg5[%c80, %c0_18] : memref<144x288xbf16, #tpu.memory_space<vmem>>, vector<16x288xbf16>
    tpu.vector_store %arg5[%c80, %c0_18], %16 {strides = array<i32>} : memref<144x288xbf16, #tpu.memory_space<vmem>>, vector<16x288xbf16>,
    %c0_19 = arith.constant 0 : index
    %c0_20 = arith.constant 0 : index
    %c36 = arith.constant 36 : index
    %18 = vector.load %arg1[%c0_19, %c0_20, %c36] : memref<1x16x342xbf16, #tpu.memory_space<vmem>>, vector<1x16x288xbf16>
    %19 = vector.shape_cast %18 : vector<1x16x288xbf16> to vector<16x288xbf16>
    %c96 = arith.constant 96 : index
    %c0_21 = arith.constant 0 : index
    %20 = vector.load %arg5[%c96, %c0_21] : memref<144x288xbf16, #tpu.memory_space<vmem>>, vector<16x288xbf16>
    tpu.vector_store %arg5[%c96, %c0_21], %19 {strides = array<i32>} : memref<144x288xbf16, #tpu.memory_space<vmem>>, vector<16x288xbf16>,
    %c0_22 = arith.constant 0 : index
    %c0_23 = arith.constant 0 : index
    %c37 = arith.constant 37 : index
    %21 = vector.load %arg1[%c0_22, %c0_23, %c37] : memref<1x16x342xbf16, #tpu.memory_space<vmem>>, vector<1x16x288xbf16>
    %22 = vector.shape_cast %21 : vector<1x16x288xbf16> to vector<16x288xbf16>
    %c112 = arith.constant 112 : index
    %c0_24 = arith.constant 0 : index
    %23 = vector.load %arg5[%c112, %c0_24] : memref<144x288xbf16, #tpu.memory_space<vmem>>, vector<16x288xbf16>
    tpu.vector_store %arg5[%c112, %c0_24], %22 {strides = array<i32>} : memref<144x288xbf16, #tpu.memory_space<vmem>>, vector<16x288xbf16>,
    %c0_25 = arith.constant 0 : index
    %c0_26 = arith.constant 0 : index
    %c38 = arith.constant 38 : index
    %24 = vector.load %arg1[%c0_25, %c0_26, %c38] : memref<1x16x342xbf16, #tpu.memory_space<vmem>>, vector<1x16x288xbf16>
    %25 = vector.shape_cast %24 : vector<1x16x288xbf16> to vector<16x288xbf16>
    %c128 = arith.constant 128 : index
    %c0_27 = arith.constant 0 : index
    %26 = vector.load %arg5[%c128, %c0_27] : memref<144x288xbf16, #tpu.memory_space<vmem>>, vector<16x288xbf16>
    tpu.vector_store %arg5[%c128, %c0_27], %25 {strides = array<i32>} : memref<144x288xbf16, #tpu.memory_space<vmem>>, vector<16x288xbf16>,
    %c0_28 = arith.constant 0 : index
    %c0_29 = arith.constant 0 : index
    %27 = vector.load %arg2[%c0_28, %c0_29] : memref<128x144xbf16, #tpu.memory_space<vmem>>, vector<128x144xbf16>
    %c0_30 = arith.constant 0 : index
    %c0_31 = arith.constant 0 : index
    %28 = vector.load %arg5[%c0_30, %c0_31] : memref<144x288xbf16, #tpu.memory_space<vmem>>, vector<144x288xbf16>
    %cst = arith.constant dense<0.000000e+00> : vector<128x288xf32>
    %29 = tpu.matmul %27, %28, %cst {dimension_numbers = #tpu.dot_dimension_numbers<[1], [0], [0], [1], [0, 0, 1, 1], [], []>} : vector<128x144xbf16>, vector<144x288xbf16>, vector<128x288xf32> -> vector<128x288xf32>
    %c0_32 = arith.constant 0 : index
    %c0_33 = arith.constant 0 : index
    %30 = vector.load %arg3[%c0_32, %c0_33] : memref<128x1xf32, #tpu.memory_space<vmem>>, vector<128x1xf32>
    %31 = vector.broadcast %30 : vector<128x1xf32> to vector<128x288xf32>
    %32 = arith.addf %29, %31 : vector<128x288xf32>
    %33 = arith.negf %32 : vector<128x288xf32>
    %34 = math.exp %33 : vector<128x288xf32>
    %cst_34 = arith.constant 1.000000e+00 : f32
    %35 = vector.broadcast %cst_34 : f32 to vector<128x288xf32>
    %36 = arith.addf %35, %34 : vector<128x288xf32>
    %37 = arith.divf %35, %36 : vector<128x288xf32>
    %38 = arith.mulf %32, %37 : vector<128x288xf32>
    %c0_35 = arith.constant 0 : index
    %c0_36 = arith.constant 0 : index
    %c0_37 = arith.constant 0 : index
    %39 = vector.load %arg4[%c0_35, %c0_36, %c0_37] : memref<1x128x288xf32, #tpu.memory_space<vmem>>, vector<1x128x288xf32>
    %40 = vector.shape_cast %39 : vector<1x128x288xf32> to vector<128x288xf32>
    %41 = vector.shape_cast %38 : vector<128x288xf32> to vector<1x128x288xf32>
    tpu.vector_store %arg4[%c0_35, %c0_36, %c0_37], %41 {strides = array<i32>} : memref<1x128x288xf32, #tpu.memory_space<vmem>>, vector<1x128x288xf32>,
    return
  }
  func.func @transform_0(%arg0: i32) -> (i32, i32, i32) {
    %c0_i32 = arith.constant 0 : i32
    %c0_i32_0 = arith.constant 0 : i32
    %c0_i32_1 = arith.constant 0 : i32
    return %arg0, %c0_i32, %c0_i32_0 : i32, i32, i32
  }
  func.func @transform_1(%arg0: i32) -> (i32, i32) {
    %c0_i32 = arith.constant 0 : i32
    %c0_i32_0 = arith.constant 0 : i32
    %c0_i32_1 = arith.constant 0 : i32
    return %c0_i32, %c0_i32_0 : i32, i32
  }
  func.func @transform_2(%arg0: i32) -> (i32, i32) {
    %c0_i32 = arith.constant 0 : i32
    %c0_i32_0 = arith.constant 0 : i32
    %c0_i32_1 = arith.constant 0 : i32
    return %c0_i32, %c0_i32_0 : i32, i32
  }
  func.func @transform_3(%arg0: i32) -> (i32, i32, i32) {
    %c0_i32 = arith.constant 0 : i32
    %c0_i32_0 = arith.constant 0 : i32
    %c0_i32_1 = arith.constant 0 : i32
    return %arg0, %c0_i32, %c0_i32_0 : i32, i32, i32
  }
}

</mosaic_0001>

<bundles_post_ra>
// kernel: tpu_custom_call.1
= control target key start
LH: loop header
LB: loop body
LE: loop exit
PB: predicated region body
PF: predicated region fallthrough
CT: control target
= control target key end

     0   :  { %s1884_s12 = smov 0   ;;  %s2433_s0 = inlined_call_operand.vmem [shape: bf16[2,16,342], index: 0, kind: input, shape index: {}]   ;;  %s2434_s1 = inlined_call_operand.vmem [shape: bf16[128,144], index: 1, kind: input, shape index: {}]   ;;  %s2435_s2 = inlined_call_operand.vmem [shape: f32[128,1], index: 2, kind: input, shape index: {}]   ;;  %s2436_s3 = inlined_call_operand.vmem [shape: f32[2,128,288], index: 3, kind: output, shape index: {}]  }
   0x1 LB: > { %s1485_s13 = sadd.s32 4294967295, %s1853_s12   ;;  %p1489_p0 = scmp.ge.s32.totalorder %s1853_s12, 1  ;;  %s1853_s12 = sphi %s1884_s12, %s13_s12  }
   0x2   : > { %p137_p1 = scmp.lt.s32.totalorder %s1853_s12, 3 }
   0x4   : > { %p138_p2 = pnand %p1489_p0, %p137_p1 }
   0x5   : > { %p161_p3 = scmp.lt.s32.totalorder (!%p138_p2), %s1485_s13, 1  ;;  %s1856_s18 = smov (!%p138_p2), 91  }
   0x6   : > { %141 = sbr.rel (%p138_p2) target bundleno = 524 (0x20c), region = 32  ;;  %s1857_s19 = smov (!%p138_p2), 92  }
   0x7   : > { %s1858_s20 = smov (!%p138_p2), 108   ;;  %s1859_s21 = smov (!%p138_p2), 109  }
   0x8   : > { %s1860_s22 = smov (!%p138_p2), 110   ;;  %s1861_s23 = smov (!%p138_p2), 126  }
   0x9   : > { %s1862_s24 = smov (!%p138_p2), 127   ;;  %s1863_s27 = smov (!%p138_p2), 90  }
   0xb   : > { %s2438_s13 = smov (!%p161_p3, %s1485_s13), 1  ;;  %v1855_v2 = vmov 0   ;;  %vm177_vm0 = vcmask 257024   ;;  %v1633_v22 = vld [vmem:[%s2434_s1 + $0x4] ss:$8 sps:$4 sm:$0xff]   ;;  %vm810_vm1 = vcmask 130048  }
   0xc   : > { %s1601_s14 = smul.u32 24, %s2438_s13  ;;  %948 = vmatprep.subr.bf16.mxu1 %v1855_v2  ;;  %1620 = vset.pattern.permute.xlu0 %v1855_v2  ;;  %v498_v26 = vld [vmem:[%s2435_s2] sm:$0xff]  ;;  %v499_v27 = vld [vmem:[%s2435_s2 + $0x8] sm:$0xff]  ;;  %v500_v28 = vld [vmem:[%s2435_s2 + $0x10] sm:$0xff]  ;;  %vm201_vm2 = vcmask 1043456   ;;  %vm401_vm3 = vcmask 744448  }
   0xd   : > { %1621 = vset.pattern.permute.xlu1 %v1855_v2  ;;  %1543 = vmatprep.mubr.msk.bf16.mxu1 %vm810_vm1, %v1633_v22  ;;  %v501_v29 = vld [vmem:[%s2435_s2 + $0x18] sm:$0xff]  ;;  %v502_v38 = vld [vmem:[%s2435_s2 + $0x20] sm:$0xff]  ;;  %v503_v39 = vld [vmem:[%s2435_s2 + $0x28] sm:$0xff]  ;;  %vm368_vm4 = vcmask 752640   ;;  %vm335_vm5 = vcmask 883712   ;;  %vm302_vm6 = vcmask 891904  }
   0xe   : > { %s1898_s17 = scalar_lea.vmem %s2433_s0, %s1601_s14  ;;  %1535 = vmatprep.mubr.msk.bf16.mxu0 %vm810_vm1, %v1633_v22  ;;  %v504_v49 = vld [vmem:[%s2435_s2 + $0x30] sm:$0xff]  ;;  %v505_v50 = vld [vmem:[%s2435_s2 + $0x38] sm:$0xff]  ;;  %v506_v58 = vld [vmem:[%s2435_s2 + $0x40] sm:$0xff]  ;;  %vm269_vm7 = vcmask 900096   ;;  %vm236_vm8 = vcmask 1031168   ;;  %vm203_vm9 = vcmask 1039360  }
   0xf   : > { %v1901_v0 = vld [vmem:[%s1898_s17 + $0xc] sm:$0xff]  ;;  %v1904_v1 = vld [vmem:[%s1898_s17] sm:$0xff]  ;;  %v383_v3 = vld [vmem:[%s1898_s17 + $0x14] sm:$0xf]  ;;  %vm434_vm10 = vcmask 736256   ;;  %s1602_s15 = smul.u32 384, %s2438_s13 }
  0x10   : > { %392 = vrot.lane.b32.xlu1 %v1901_v0, %s1856_s18  ;;  %388 = vrot.lane.b32.xlu0 %v1904_v1, %s1856_s18  ;;  %v381_v4 = vld [vmem:[%s1898_s17 + $0x8] sm:$0xf]  ;;  %v350_v6 = vld [vmem:[%s1898_s17 + $0x14] sm:$0xf]  ;;  %v1509_v18 = vcombine.high %v1904_v1, %v1901_v0  ;;  %v1508_v19 = vcombine.low %v1904_v1, %v1901_v0  ;;  %vm1383_vm11 = vcmask 261120  }
  0x11   : > { %v348_v5 = vld [vmem:[%s1898_s17 + $0x8] sm:$0xf]  ;;  %v317_v8 = vld [vmem:[%s1898_s17 + $0x14] sm:$0xf] }
  0x12   : > { %v315_v7 = vld [vmem:[%s1898_s17 + $0x8] sm:$0xf]  ;;  %v284_v10 = vld [vmem:[%s1898_s17 + $0x14] sm:$0xf] }
  0x13   : > { %v282_v9 = vld [vmem:[%s1898_s17 + $0x8] sm:$0xf]  ;;  %v251_v12 = vld [vmem:[%s1898_s17 + $0x14] sm:$0xf] }
  0x14   : > { %394 = vrot.lane.b32.xlu1 %v383_v3, %s1856_s18  ;;  %390 = vrot.lane.b32.xlu0 %v381_v4, %s1856_s18  ;;  %v249_v11 = vld [vmem:[%s1898_s17 + $0x8] sm:$0xf]  ;;  %v218_v14 = vld [vmem:[%s1898_s17 + $0x14] sm:$0xf] }
  0x15   : > { %v216_v13 = vld [vmem:[%s1898_s17 + $0x8] sm:$0xf]  ;;  %v175_v16 = vld [vmem:[%s1898_s17 + $0x14] sm:$0xf] }
  0x16   : > { %v173_v15 = vld [vmem:[%s1898_s17 + $0x8] sm:$0xf]  ;;  %180 = vst.msk [vmem:[#allocation2 + $0x14] sm:$0xf] %vm177_vm0, %v175_v16  ;;  %v184_v20 = vld [vmem:[%s1898_s17 + $0x14] sm:$0xf] }
  0x17   : > { %178 = vst.msk [vmem:[#allocation2 + $0x8] sm:$0xf] %vm177_vm0, %v173_v15  ;;  %v182_v17 = vld [vmem:[%s1898_s17 + $0x8] sm:$0xf]  ;;  %v416_v23 = vld [vmem:[%s1898_s17 + $0x14] sm:$0xf] }
  0x18   : > { %357 = vrot.lane.b32.xlu1 %v348_v5, %s1857_s19  ;;  %355 = vrot.lane.b32.xlu0 %v1904_v1, %s1857_s19  ;;  %v414_v21 = vld [vmem:[%s1898_s17 + $0x8] sm:$0xf]  ;;  %v510_v16 = vld [vmem:[%s2435_s2 + $0x60] sm:$0xff]  ;;  %s2186_s17 = scalar_lea.vmem %s2436_s3, %s1602_s15 }
  0x19   : > { %v507_v62 = vld [vmem:[%s2435_s2 + $0x48] sm:$0xff] }
  0x1a   : > { %v511_v22 = vld [vmem:[%s2435_s2 + $0x68] sm:$0xff] }
  0x1c   : > { %361 = vrot.lane.b32.xlu1 %v350_v6, %s1857_s19  ;;  %359 = vrot.lane.b32.xlu0 %v1901_v0, %s1857_s19 }
  0x20   : > { %324 = vrot.lane.b32.xlu1 %v315_v7, %s1858_s20  ;;  %322 = vrot.lane.b32.xlu0 %v1904_v1, %s1858_s20  ;;  %v508_v7 = vld [vmem:[%s2435_s2 + $0x50] sm:$0xff] }
  0x24   : > { %328 = vrot.lane.b32.xlu1 %v317_v8, %s1858_s20  ;;  %326 = vrot.lane.b32.xlu0 %v1901_v0, %s1858_s20 }
  0x28   : > { %291 = vrot.lane.b32.xlu1 %v282_v9, %s1859_s21  ;;  %289 = vrot.lane.b32.xlu0 %v1904_v1, %s1859_s21 }
  0x2c   : > { %295 = vrot.lane.b32.xlu1 %v284_v10, %s1859_s21  ;;  %293 = vrot.lane.b32.xlu0 %v1901_v0, %s1859_s21 }
  0x30   : > { %258 = vrot.lane.b32.xlu1 %v249_v11, %s1860_s22  ;;  %256 = vrot.lane.b32.xlu0 %v1904_v1, %s1860_s22 }
  0x34   : > { %262 = vrot.lane.b32.xlu1 %v251_v12, %s1860_s22  ;;  %260 = vrot.lane.b32.xlu0 %v1901_v0, %s1860_s22  ;;  %v509_v12 = vld [vmem:[%s2435_s2 + $0x58] sm:$0xff] }
  0x38   : > { %225 = vrot.lane.b32.xlu1 %v216_v13, %s1861_s23  ;;  %223 = vrot.lane.b32.xlu0 %v1904_v1, %s1861_s23 }
  0x3c   : > { %229 = vrot.lane.b32.xlu1 %v218_v14, %s1861_s23  ;;  %227 = vrot.lane.b32.xlu0 %v1901_v0, %s1861_s23 }
  0x40   : > { %191 = vrot.lane.b32.xlu1 %v182_v17, %s1862_s24  ;;  %189 = vrot.lane.b32.xlu0 %v1904_v1, %s1862_s24 }
  0x44   : > { %195 = vrot.lane.b32.xlu1 %v184_v20, %s1862_s24  ;;  %193 = vrot.lane.b32.xlu0 %v1901_v0, %s1862_s24 }
  0x48   : > { %423 = vrot.lane.b32.xlu1 %v414_v21, %s1863_s27  ;;  %421 = vrot.lane.b32.xlu0 %v1904_v1, %s1863_s27  ;;  %v1637_v1 = vld [vmem:[%s2434_s1 + $0x24] ss:$8 sps:$4 sm:$0xff]  }
  0x4c   : > { %427 = vrot.lane.b32.xlu1 %v416_v23, %s1863_s27  ;;  %425 = vrot.lane.b32.xlu0 %v1901_v0, %s1863_s27  ;;  %v1636_v0 = vld [vmem:[%s2434_s1 + $0x10] ss:$8 sps:$4 sm:$0xff]  }
  0x50   : > { %516 = vperm.xlu0 %1620, %v498_v26   ;;  %521 = vperm.xlu1 %1621, %v499_v27  }
  0x54   : > { %526 = vperm.xlu1 %1621, %v500_v28   ;;  %531 = vperm.xlu0 %1620, %v501_v29   ;;  %v512_v28 = vld [vmem:[%s2435_s2 + $0x70] sm:$0xff] }
  0x58   : > { %536 = vperm.xlu1 %1621, %v502_v38   ;;  %541 = vperm.xlu0 %1620, %v503_v39  }
  0x5c   : > { %546 = vperm.xlu1 %1621, %v504_v49   ;;  %551 = vperm.xlu0 %1620, %v505_v50  }
  0x60   : > { %556 = vperm.xlu1 %1621, %v506_v58   ;;  %561 = vperm.xlu0 %1620, %v507_v62  }
  0x64   : > { %566 = vperm.xlu1 %1621, %v508_v7   ;;  %571 = vperm.xlu0 %1620, %v509_v12  }
  0x68   : > { %576 = vperm.xlu1 %1621, %v510_v16   ;;  %581 = vperm.xlu0 %1620, %v511_v22  }
  0x6c   : > { %586 = vperm.xlu1 %1621, %v512_v28  }
  0x82   : > { %v393_v24 = vpop.permute.xlu1 %392  ;;  %v389_v25 = vpop.permute.xlu0 %388 }
  0x83   : > { %v398_v32 = vrot.slane %v393_v24, 4  ;;  %v396_v33 = vrot.slane %v389_v25, 4 }
  0x86   : > { %v395_v30 = vpop.permute.xlu1 %394  ;;  %v391_v31 = vpop.permute.xlu0 %390 }
  0x87   : > { %v399_v34 = vrot.slane %v395_v30, 4  ;;  %412 = vst.msk [vmem:[#allocation2 + $0xbc] sm:$0xf] %vm177_vm0, %v395_v30  ;;  %v397_v35 = vrot.slane %v391_v31, 4  ;;  %410 = vst.msk [vmem:[#allocation2 + $0xb0] sm:$0xf] %vm177_vm0, %v391_v31 }
  0x89   : > { %v403_v36 = vsel %vm201_vm2, %v398_v32, %v399_v34  ;;  %v400_v37 = vsel %vm201_vm2, %v396_v33, %v397_v35  ;;  %v513_v33 = vld [vmem:[%s2435_s2 + $0x78] sm:$0xff] }
  0x8a   : > { %v404_v40 = vsel %vm401_vm3, %v393_v24, %v403_v36  ;;  %v402_v41 = vsel %vm401_vm3, %v389_v25, %v400_v37  ;;  %v358_v42 = vpop.permute.xlu1 %357  ;;  %v356_v43 = vpop.permute.xlu0 %355  ;;  %591 = vperm.xlu0 %1620, %v513_v33  }
  0x8b   : > { %v364_v44 = vrot.slane %v358_v42, 4  ;;  %377 = vst.msk [vmem:[#allocation2 + $0x98] sm:$0xf] %vm177_vm0, %v358_v42  ;;  %v363_v45 = vrot.slane %v356_v43, 4  ;;  %v1530_v46 = vcombine.high %v402_v41, %v404_v40  ;;  %v1529_v47 = vcombine.low %v402_v41, %v404_v40 }
  0x8d   : > { %v367_v48 = vsel %vm201_vm2, %v363_v45, %v364_v44  ;;  %835 = vmatprep.subr.bf16.mxu0 %v1530_v46 }
  0x8e   : > { %v369_v51 = vsel %vm368_vm4, %v356_v43, %v367_v48  ;;  %v362_v52 = vpop.permute.xlu1 %361  ;;  %v360_v53 = vpop.permute.xlu0 %359  ;;  %v1622_v54 = vld [vmem:[#allocation2 + $0xb0] ss:$12 sps:$4 sm:$0xff]   ;;  %836 = vmatpush1.bf16.msra.mxu0 %v1529_v47 }
  0x8f   : > { %v366_v55 = vrot.slane %v362_v52, 4  ;;  %379 = vst.msk [vmem:[#allocation2 + $0xa4] sm:$0xf] %vm177_vm0, %v362_v52  ;;  %v365_v56 = vrot.slane %v360_v53, 4  ;;  %949 = vmatpush1.bf16.msra.mxu1 %v1622_v54 }
  0x90   : > { %950 = vmatprep.subr.bf16.mxu1 %v1855_v2 }
  0x91   : > { %v370_v57 = vsel %vm201_vm2, %v365_v56, %v366_v55 }
  0x92   : > { %v371_v59 = vsel %vm368_vm4, %v360_v53, %v370_v57  ;;  %v325_v60 = vpop.permute.xlu1 %324  ;;  %v323_v61 = vpop.permute.xlu0 %322 }
  0x93   : > { %v331_v63 = vrot.slane %v325_v60, 4  ;;  %344 = vst.msk [vmem:[#allocation2 + $0x80] sm:$0xf] %vm177_vm0, %v325_v60  ;;  %v330_v3 = vrot.slane %v323_v61, 4  ;;  %v1527_v4 = vcombine.high %v369_v51, %v371_v59  ;;  %v1526_v5 = vcombine.low %v369_v51, %v371_v59 }
  0x95   : > { %v334_v6 = vsel %vm201_vm2, %v330_v3, %v331_v63  ;;  %837 = vmatprep.subr.bf16.mxu0 %v1527_v4 }
  0x96   : > { %v336_v8 = vsel %vm335_vm5, %v323_v61, %v334_v6  ;;  %v329_v9 = vpop.permute.xlu1 %328  ;;  %v327_v10 = vpop.permute.xlu0 %326  ;;  %v1623_v11 = vld [vmem:[#allocation2 + $0x98] ss:$12 sps:$4 sm:$0xff]   ;;  %838 = vmatpush1.bf16.msra.mxu0 %v1526_v5 }
  0x97   : > { %v333_v13 = vrot.slane %v329_v9, 4  ;;  %346 = vst.msk [vmem:[#allocation2 + $0x8c] sm:$0xf] %vm177_vm0, %v329_v9  ;;  %v332_v14 = vrot.slane %v327_v10, 4  ;;  %951 = vmatpush1.bf16.msra.mxu1 %v1623_v11 }
  0x98   : > { %952 = vmatprep.subr.bf16.mxu1 %v1855_v2 }
  0x99   : > { %v337_v15 = vsel %vm201_vm2, %v332_v14, %v333_v13 }
  0x9a   : > { %v338_v17 = vsel %vm335_vm5, %v327_v10, %v337_v15  ;;  %v292_v20 = vpop.permute.xlu1 %291  ;;  %v290_v21 = vpop.permute.xlu0 %289 }
  0x9b   : > { %v298_v23 = vrot.slane %v292_v20, 4  ;;  %311 = vst.msk [vmem:[#allocation2 + $0x68] sm:$0xf] %vm177_vm0, %v292_v20  ;;  %v297_v24 = vrot.slane %v290_v21, 4  ;;  %v1524_v25 = vcombine.high %v336_v8, %v338_v17  ;;  %v1523_v26 = vcombine.low %v336_v8, %v338_v17 }
  0x9d   : > { %v301_v27 = vsel %vm201_vm2, %v297_v24, %v298_v23  ;;  %839 = vmatprep.subr.bf16.mxu0 %v1524_v25 }
  0x9e   : > { %v303_v29 = vsel %vm302_vm6, %v290_v21, %v301_v27  ;;  %v296_v30 = vpop.permute.xlu1 %295  ;;  %v294_v31 = vpop.permute.xlu0 %293  ;;  %v1624_v32 = vld [vmem:[#allocation2 + $0x80] ss:$12 sps:$4 sm:$0xff]   ;;  %840 = vmatpush1.bf16.msra.mxu0 %v1523_v26 }
  0x9f   : > { %v300_v34 = vrot.slane %v296_v30, 4  ;;  %313 = vst.msk [vmem:[#allocation2 + $0x74] sm:$0xf] %vm177_vm0, %v296_v30  ;;  %v299_v35 = vrot.slane %v294_v31, 4  ;;  %953 = vmatpush1.bf16.msra.mxu1 %v1624_v32 }
  0xa0   : > { %954 = vmatprep.subr.bf16.mxu1 %v1855_v2 }
  0xa1   : > { %v304_v36 = vsel %vm201_vm2, %v299_v35, %v300_v34 }
  0xa2   : > { %v305_v37 = vsel %vm302_vm6, %v294_v31, %v304_v36  ;;  %v259_v38 = vpop.permute.xlu1 %258  ;;  %v257_v39 = vpop.permute.xlu0 %256 }
  0xa3   : > { %v265_v40 = vrot.slane %v259_v38, 4  ;;  %278 = vst.msk [vmem:[#allocation2 + $0x50] sm:$0xf] %vm177_vm0, %v259_v38  ;;  %v264_v41 = vrot.slane %v257_v39, 4  ;;  %v1521_v42 = vcombine.high %v303_v29, %v305_v37  ;;  %v1520_v43 = vcombine.low %v303_v29, %v305_v37  ;;  %v1629_v37 = vld [vmem:[#allocation2 + $0x8] ss:$12 sps:$4 sm:$0xff]  }
  0xa5   : > { %v268_v44 = vsel %vm201_vm2, %v264_v41, %v265_v40  ;;  %841 = vmatprep.subr.bf16.mxu0 %v1521_v42 }
  0xa6   : > { %v270_v45 = vsel %vm269_vm7, %v257_v39, %v268_v44  ;;  %v263_v46 = vpop.permute.xlu1 %262  ;;  %v261_v47 = vpop.permute.xlu0 %260  ;;  %v1625_v48 = vld [vmem:[#allocation2 + $0x68] ss:$12 sps:$4 sm:$0xff]   ;;  %842 = vmatpush1.bf16.msra.mxu0 %v1520_v43  ;;  %v1642_v44 = vld [vmem:[%s2434_s1 + $0x30] ss:$8 sps:$4 sm:$0xff]  }
  0xa7   : > { %v267_v49 = vrot.slane %v263_v46, 4  ;;  %280 = vst.msk [vmem:[#allocation2 + $0x5c] sm:$0xf] %vm177_vm0, %v263_v46  ;;  %v266_v50 = vrot.slane %v261_v47, 4  ;;  %955 = vmatpush1.bf16.msra.mxu1 %v1625_v48  ;;  %v1634_v43 = vld [vmem:[%s2434_s1 + $0x14] ss:$8 sps:$4 sm:$0xff]  }
  0xa8   : > { %956 = vmatprep.subr.bf16.mxu1 %v1855_v2  ;;  %v1645_v46 = vld [vmem:[%s2434_s1 + $0x40] ss:$8 sps:$4 sm:$0xff]   ;;  %v1648_v48 = vld [vmem:[%s2434_s1 + $0x50] ss:$8 sps:$4 sm:$0xff]  }
  0xa9   : > { %v271_v51 = vsel %vm201_vm2, %v266_v50, %v267_v49  ;;  %v1649_v49 = vld [vmem:[%s2434_s1 + $0x64] ss:$8 sps:$4 sm:$0xff]   ;;  %v1651_v50 = vld [vmem:[%s2434_s1 + $0x60] ss:$8 sps:$4 sm:$0xff]  }
  0xaa   : > { %v272_v52 = vsel %vm269_vm7, %v261_v47, %v271_v51  ;;  %v226_v53 = vpop.permute.xlu1 %225  ;;  %v224_v54 = vpop.permute.xlu0 %223  ;;  %v1646_v47 = vld [vmem:[%s2434_s1 + $0x54] ss:$8 sps:$4 sm:$0xff]  }
  0xab   : > { %v232_v55 = vrot.slane %v226_v53, 4  ;;  %245 = vst.msk [vmem:[#allocation2 + $0x38] sm:$0xf] %vm177_vm0, %v226_v53  ;;  %v231_v56 = vrot.slane %v224_v54, 4  ;;  %v1518_v57 = vcombine.high %v270_v45, %v272_v52  ;;  %v1517_v58 = vcombine.low %v270_v45, %v272_v52  ;;  %v1643_v45 = vld [vmem:[%s2434_s1 + $0x44] ss:$8 sps:$4 sm:$0xff]  }
  0xac   : > { %v1652_v51 = vld [vmem:[%s2434_s1 + $0x74] ss:$8 sps:$4 sm:$0xff]   ;;  %v1654_v52 = vld [vmem:[%s2434_s1 + $0x70] ss:$8 sps:$4 sm:$0xff]  }
  0xad   : > { %v235_v59 = vsel %vm201_vm2, %v231_v56, %v232_v55  ;;  %843 = vmatprep.subr.bf16.mxu0 %v1518_v57 }
  0xae   : > { %v237_v60 = vsel %vm236_vm8, %v224_v54, %v235_v59  ;;  %v230_v61 = vpop.permute.xlu1 %229  ;;  %v228_v62 = vpop.permute.xlu0 %227  ;;  %v1626_v63 = vld [vmem:[#allocation2 + $0x50] ss:$12 sps:$4 sm:$0xff]   ;;  %844 = vmatpush1.bf16.msra.mxu0 %v1517_v58 }
  0xaf   : > { %v234_v3 = vrot.slane %v230_v61, 4  ;;  %247 = vst.msk [vmem:[#allocation2 + $0x44] sm:$0xf] %vm177_vm0, %v230_v61  ;;  %v233_v4 = vrot.slane %v228_v62, 4  ;;  %957 = vmatpush1.bf16.msra.mxu1 %v1626_v63 }
  0xb0   : > { %958 = vmatprep.subr.bf16.mxu1 %v1855_v2 }
  0xb1   : > { %v238_v5 = vsel %vm201_vm2, %v233_v4, %v234_v3 }
  0xb2   : > { %v239_v6 = vsel %vm236_vm8, %v228_v62, %v238_v5  ;;  %v192_v7 = vpop.permute.xlu1 %191  ;;  %v190_v8 = vpop.permute.xlu0 %189 }
  0xb3   : > { %v198_v9 = vrot.slane %v192_v7, 4  ;;  %212 = vst.msk [vmem:[#allocation2 + $0x20] sm:$0xf] %vm177_vm0, %v192_v7  ;;  %v197_v10 = vrot.slane %v190_v8, 4  ;;  %v1515_v11 = vcombine.high %v237_v60, %v239_v6  ;;  %v1514_v12 = vcombine.low %v237_v60, %v239_v6 }
  0xb5   : > { %v202_v13 = vsel %vm201_vm2, %v197_v10, %v198_v9  ;;  %845 = vmatprep.subr.bf16.mxu0 %v1515_v11 }
  0xb6   : > { %v204_v14 = vsel %vm203_vm9, %v190_v8, %v202_v13  ;;  %v196_v15 = vpop.permute.xlu1 %195  ;;  %v194_v16 = vpop.permute.xlu0 %193  ;;  %v1627_v17 = vld [vmem:[#allocation2 + $0x38] ss:$12 sps:$4 sm:$0xff]   ;;  %846 = vmatpush1.bf16.msra.mxu0 %v1514_v12 }
  0xb7   : > { %v200_v20 = vrot.slane %v196_v15, 4  ;;  %214 = vst.msk [vmem:[#allocation2 + $0x2c] sm:$0xf] %vm177_vm0, %v196_v15  ;;  %v199_v21 = vrot.slane %v194_v16, 4  ;;  %959 = vmatpush1.bf16.msra.mxu1 %v1627_v17 }
  0xb8   : > { %960 = vmatprep.subr.bf16.mxu1 %v1855_v2 }
  0xb9   : > { %v205_v22 = vsel %vm201_vm2, %v199_v21, %v200_v20 }
  0xba   : > { %v206_v23 = vsel %vm203_vm9, %v194_v16, %v205_v22  ;;  %v424_v24 = vpop.permute.xlu1 %423  ;;  %v422_v25 = vpop.permute.xlu0 %421 }
  0xbb   : > { %v430_v26 = vrot.slane %v424_v24, 4  ;;  %443 = vst.msk [vmem:[#allocation2 + $0xc8] sm:$0xf] %vm177_vm0, %v424_v24  ;;  %v429_v27 = vrot.slane %v422_v25, 4  ;;  %v1512_v28 = vcombine.high %v204_v14, %v206_v23  ;;  %v1511_v29 = vcombine.low %v204_v14, %v206_v23 }
  0xbd   : > { %v433_v30 = vsel %vm201_vm2, %v429_v27, %v430_v26  ;;  %847 = vmatprep.subr.bf16.mxu0 %v1512_v28 }
  0xbe   : > { %v435_v31 = vsel %vm434_vm10, %v422_v25, %v433_v30  ;;  %v428_v32 = vpop.permute.xlu1 %427  ;;  %v426_v33 = vpop.permute.xlu0 %425  ;;  %v1628_v34 = vld [vmem:[#allocation2 + $0x20] ss:$12 sps:$4 sm:$0xff]   ;;  %848 = vmatpush1.bf16.msra.mxu0 %v1511_v29 }
  0xbf   : > { %v432_v35 = vrot.slane %v428_v32, 4  ;;  %445 = vst.msk [vmem:[#allocation2 + $0xd4] sm:$0xf] %vm177_vm0, %v428_v32  ;;  %v431_v36 = vrot.slane %v426_v33, 4  ;;  %849 = vmatprep.subr.bf16.mxu0 %v1509_v18  ;;  %961 = vmatpush1.bf16.msra.mxu1 %v1628_v34  ;;  %v1631_v18 = vld [vmem:[%s2434_s1] ss:$8 sps:$4 sm:$0xff]  }
  0xc0   : > { %962 = vmatprep.subr.bf16.mxu1 %v1855_v2 }
  0xc1   : > { %v436_v38 = vsel %vm201_vm2, %v431_v36, %v432_v35 }
  0xc2   : > { %v437_v39 = vsel %vm434_vm10, %v426_v33, %v436_v38  ;;  %850 = vmatpush1.bf16.msra.mxu0 %v1508_v19  ;;  %v1640_v19 = vld [vmem:[%s2434_s1 + $0x34] ss:$8 sps:$4 sm:$0xff]  }
  0xc3   : > { %v1533_v40 = vcombine.high %v435_v31, %v437_v39  ;;  %v1532_v41 = vcombine.low %v435_v31, %v437_v39  ;;  %963 = vmatpush1.bf16.msra.mxu1 %v1629_v37 }
  0xc4   : > { %978 = vmatprep.subr.bf16.mxu1 %v1855_v2  ;;  %v1639_v2 = vld [vmem:[%s2434_s1 + $0x20] ss:$8 sps:$4 sm:$0xff]  }
  0xc5   : > { %865 = vmatprep.subr.bf16.mxu0 %v1533_v40 }
  0xc6   : > { %v1630_v42 = vld [vmem:[#allocation2 + $0xc8] ss:$12 sps:$4 sm:$0xff]   ;;  %866 = vmatpush2.bf16.msra.mxu0 %v1532_v41 }
  0xc7   : > { %979 = vmatpush2.bf16.msra.mxu1 %v1630_v42 }
  0xc9   : > { %868 = vmatmul.mubr.bf16.vlgmr.msra.gmra.mxu0 %v1631_v18 }
  0xca   : > { %1536 = vmatprep.mubr.msk.bf16.mxu0 %vm810_vm1, %v1634_v43  ;;  %981 = vmatmul.mubr.bf16.vlgmr.msra.gmra.mxu1 %v1631_v18 }
  0xcb   : > { %1544 = vmatprep.mubr.msk.bf16.mxu1 %vm810_vm1, %v1634_v43  ;;  %v517_v53 = vpop.permute.xlu0 %516  ;;  %v522_v54 = vpop.permute.xlu1 %521 }
  0xcf   : > { %v527_v5 = vpop.permute.xlu1 %526  ;;  %v532_v22 = vpop.permute.xlu0 %531 }
  0xd1   : > { %878 = vmatmul.mubr.bf16.gmra.mxu0 %v1636_v0 }
  0xd2   : > { %1537 = vmatprep.mubr.msk.bf16.mxu0 %vm810_vm1, %v1637_v1  ;;  %989 = vmatmul.mubr.bf16.gmra.mxu1 %v1636_v0 }
  0xd3   : > { %1545 = vmatprep.mubr.msk.bf16.mxu1 %vm810_vm1, %v1637_v1  ;;  %v537_v33 = vpop.permute.xlu1 %536 }
  0xd9   : > { %888 = vmatmul.mubr.bf16.gmra.mxu0 %v1639_v2 }
  0xda   : > { %1538 = vmatprep.mubr.msk.bf16.mxu0 %vm810_vm1, %v1640_v19  ;;  %997 = vmatmul.mubr.bf16.gmra.mxu1 %v1639_v2 }
  0xdb   : > { %1546 = vmatprep.mubr.msk.bf16.mxu1 %vm810_vm1, %v1640_v19 }
  0xe1   : > { %898 = vmatmul.mubr.bf16.gmra.mxu0 %v1642_v44 }
  0xe2   : > { %1539 = vmatprep.mubr.msk.bf16.mxu0 %vm810_vm1, %v1643_v45  ;;  %1005 = vmatmul.mubr.bf16.gmra.mxu1 %v1642_v44 }
  0xe3   : > { %1547 = vmatprep.mubr.msk.bf16.mxu1 %vm810_vm1, %v1643_v45 }
  0xe9   : > { %908 = vmatmul.mubr.bf16.gmra.mxu0 %v1645_v46 }
  0xea   : > { %1540 = vmatprep.mubr.msk.bf16.mxu0 %vm810_vm1, %v1646_v47  ;;  %1013 = vmatmul.mubr.bf16.gmra.mxu1 %v1645_v46 }
  0xeb   : > { %1548 = vmatprep.mubr.msk.bf16.mxu1 %vm810_vm1, %v1646_v47  ;;  %v542_v47 = vpop.permute.xlu0 %541 }
  0xf1   : > { %918 = vmatmul.mubr.bf16.gmra.mxu0 %v1648_v48 }
  0xf2   : > { %1541 = vmatprep.mubr.msk.bf16.mxu0 %vm810_vm1, %v1649_v49  ;;  %1021 = vmatmul.mubr.bf16.gmra.mxu1 %v1648_v48 }
  0xf3   : > { %1549 = vmatprep.mubr.msk.bf16.mxu1 %vm810_vm1, %v1649_v49 }
  0xf9   : > { %928 = vmatmul.mubr.bf16.gmra.mxu0 %v1651_v50 }
  0xfa   : > { %1542 = vmatprep.mubr.msk.bf16.mxu0 %vm810_vm1, %v1652_v51  ;;  %1029 = vmatmul.mubr.bf16.gmra.mxu1 %v1651_v50 }
  0xfb   : > { %1550 = vmatprep.mubr.msk.bf16.mxu1 %vm810_vm1, %v1652_v51 }
 0x101   : > { %938 = vmatmul.mubr.bf16.gmra.mxu0 %v1654_v52 }
 0x102   : > { %1037 = vmatmul.mubr.bf16.gmra.mxu1 %v1654_v52 }
 0x189   : > { %v869_v55 = vpop.f32.mrf.mxu0 }
 0x18a   : > { %v2123_v56 = vadd.f32 %v869_v55, %v517_v53  ;;  %v982_v57 = vpop.f32.mrf.mxu1 }
 0x18b   : > { %v871_v58 = vpop.f32.mrf.mxu0  ;;  %v2125_v59 = vadd.f32 %v982_v57, %v517_v53 }
 0x18c   : > { %v1551_v60 = vmul.f32 -1.442695, %v2123_v56  ;;  %v2128_v61 = vadd.f32 %v871_v58, %v517_v53  ;;  %v984_v62 = vpop.f32.mrf.mxu1 }
 0x18d   : > { %v873_v63 = vpop.f32.mrf.mxu0  ;;  %v1553_v3 = vmul.f32 -1.442695, %v2125_v59 }
 0x18e   : > { %1655 = vpow2.f32 %v1551_v60  ;;  %v1552_v4 = vmul.f32 -1.442695, %v2128_v61  ;;  %v2132_v6 = vadd.f32 %v873_v63, %v522_v54  ;;  %v985_v7 = vpop.f32.mrf.mxu1 }
 0x18f   : > { %v875_v8 = vpop.f32.mrf.mxu0  ;;  %1657 = vpow2.f32 %v1553_v3  ;;  %v2134_v9 = vadd.f32 %v985_v7, %v522_v54 }
 0x190   : > { %v1554_v10 = vmul.f32 -1.442695, %v2132_v6  ;;  %v2137_v11 = vadd.f32 %v875_v8, %v522_v54  ;;  %v987_v12 = vpop.f32.mrf.mxu1  ;;  %1659 = vpow2.f32 %v1552_v4 }
 0x191   : > { %v879_v13 = vpop.f32.mrf.mxu0  ;;  %v1556_v14 = vmul.f32 -1.442695, %v2134_v9  ;;  %v547_v12 = vpop.permute.xlu1 %546 }
 0x192   : > { %1661 = vpow2.f32 %v1554_v10  ;;  %v1555_v15 = vmul.f32 -1.442695, %v2137_v11  ;;  %v2141_v16 = vadd.f32 %v879_v13, %v527_v5  ;;  %v990_v17 = vpop.f32.mrf.mxu1 }
 0x193   : > { %v881_v20 = vpop.f32.mrf.mxu0  ;;  %1663 = vpow2.f32 %v1556_v14  ;;  %v2143_v21 = vadd.f32 %v990_v17, %v527_v5 }
 0x194   : > { %v1557_v23 = vmul.f32 -1.442695, %v2141_v16  ;;  %v2146_v24 = vadd.f32 %v881_v20, %v527_v5  ;;  %v992_v25 = vpop.f32.mrf.mxu1  ;;  %1665 = vpow2.f32 %v1555_v15 }
 0x195   : > { %v883_v26 = vpop.f32.mrf.mxu0  ;;  %v1559_v27 = vmul.f32 -1.442695, %v2143_v21 }
 0x196   : > { %1667 = vpow2.f32 %v1557_v23  ;;  %v1558_v28 = vmul.f32 -1.442695, %v2146_v24  ;;  %v2150_v29 = vadd.f32 %v883_v26, %v532_v22  ;;  %v993_v30 = vpop.f32.mrf.mxu1 }
 0x197   : > { %v885_v31 = vpop.f32.mrf.mxu0  ;;  %1669 = vpow2.f32 %v1559_v27  ;;  %v2152_v32 = vadd.f32 %v993_v30, %v532_v22 }
 0x198   : > { %v1560_v34 = vmul.f32 -1.442695, %v2150_v29  ;;  %v2155_v35 = vadd.f32 %v885_v31, %v532_v22  ;;  %v995_v36 = vpop.f32.mrf.mxu1  ;;  %1671 = vpow2.f32 %v1558_v28  ;;  %v552_v31 = vpop.permute.xlu0 %551 }
 0x199   : > { %v889_v37 = vpop.f32.mrf.mxu0  ;;  %v1562_v38 = vmul.f32 -1.442695, %v2152_v32 }
 0x19a   : > { %1673 = vpow2.f32 %v1560_v34  ;;  %v1561_v39 = vmul.f32 -1.442695, %v2155_v35  ;;  %v2159_v40 = vadd.f32 %v889_v37, %v537_v33  ;;  %v998_v18 = vpop.f32.mrf.mxu1 }
 0x19b   : > { %v1656_v41 = vpop.eup %1655  ;;  %v891_v42 = vpop.f32.mrf.mxu0  ;;  %1675 = vpow2.f32 %v1562_v38  ;;  %v2161_v0 = vadd.f32 %v998_v18, %v537_v33 }
 0x19c   : > { %v1189_v43 = vadd.f32 1.0, %v1656_v41  ;;  %v1563_v1 = vmul.f32 -1.442695, %v2159_v40  ;;  %v1658_v2 = vpop.eup %1657  ;;  %v1000_v19 = vpop.f32.mrf.mxu1  ;;  %1677 = vpow2.f32 %v1561_v39  ;;  %v2168_v5 = vadd.f32 %v891_v42, %v537_v33 }
 0x19d   : > { %v893_v44 = vpop.f32.mrf.mxu0  ;;  %v1660_v45 = vpop.eup %1659  ;;  %v1191_v46 = vadd.f32 1.0, %v1658_v2  ;;  %v1565_v50 = vmul.f32 -1.442695, %v2161_v0 }
 0x19e   : > { %1679 = vrcp.f32 %v1189_v43  ;;  %v1190_v49 = vadd.f32 1.0, %v1660_v45  ;;  %v1001_v51 = vpop.f32.mrf.mxu1  ;;  %v1564_v26 = vmul.f32 -1.442695, %v2168_v5  ;;  %v2174_v33 = vadd.f32 %v893_v44, %v542_v47 }
 0x19f   : > { %v1662_v48 = vpop.eup %1661  ;;  %1681 = vpow2.f32 %v1563_v1  ;;  %v895_v52 = vpop.f32.mrf.mxu0  ;;  %v2165_v54 = vadd.f32 %v1001_v51, %v542_v47 }
 0x1a0   : > { %1683 = vrcp.f32 %v1191_v46  ;;  %v1192_v53 = vadd.f32 1.0, %v1662_v48  ;;  %v1664_v55 = vpop.eup %1663  ;;  %v1003_v57 = vpop.f32.mrf.mxu1  ;;  %v2176_v36 = vadd.f32 %v895_v52, %v542_v47  ;;  %v1566_v46 = vmul.f32 -1.442695, %v2174_v33 }
 0x1a1   : > { %1685 = vrcp.f32 %v1190_v49  ;;  %v899_v58 = vpop.f32.mrf.mxu0  ;;  %v1666_v60 = vpop.eup %1665  ;;  %v1194_v62 = vadd.f32 1.0, %v1664_v55  ;;  %v1568_v4 = vmul.f32 -1.442695, %v2165_v54 }
 0x1a2   : > { %1687 = vrcp.f32 %v1192_v53  ;;  %v1193_v3 = vadd.f32 1.0, %v1666_v60  ;;  %v1006_v7 = vpop.f32.mrf.mxu1  ;;  %v557_v47 = vpop.permute.xlu1 %556  ;;  %v2190_v48 = vadd.f32 %v899_v58, %v547_v12  ;;  %v1567_v51 = vmul.f32 -1.442695, %v2176_v36 }
 0x1a3   : > { %v1668_v63 = vpop.eup %1667  ;;  %1689 = vpow2.f32 %v1565_v50  ;;  %v901_v8 = vpop.f32.mrf.mxu0  ;;  %v2170_v22 = vadd.f32 %v1006_v7, %v547_v12 }
 0x1a4   : > { %1691 = vrcp.f32 %v1194_v62  ;;  %v1195_v10 = vadd.f32 1.0, %v1668_v63  ;;  %v1670_v13 = vpop.eup %1669  ;;  %v1008_v14 = vpop.f32.mrf.mxu1  ;;  %v2193_v52 = vadd.f32 %v901_v8, %v547_v12 }
 0x1a5   : > { %1693 = vrcp.f32 %v1193_v3  ;;  %v903_v15 = vpop.f32.mrf.mxu0  ;;  %v1672_v17 = vpop.eup %1671  ;;  %v1197_v20 = vadd.f32 1.0, %v1670_v13  ;;  %v1571_v18 = vmul.f32 -1.442695, %v2170_v22 }
 0x1a6   : > { %1695 = vrcp.f32 %v1195_v10  ;;  %v1196_v25 = vadd.f32 1.0, %v1672_v17  ;;  %v1009_v27 = vpop.f32.mrf.mxu1  ;;  %v2207_v8 = vadd.f32 %v903_v15, %v552_v31  ;;  %v2212_v14 = vpop.permute.xlu0 %561 }
 0x1a7   : > { %v1674_v23 = vpop.eup %1673  ;;  %1697 = vpow2.f32 %v1568_v4  ;;  %v905_v28 = vpop.f32.mrf.mxu0  ;;  %v2181_v42 = vadd.f32 %v1009_v27, %v552_v31 }
 0x1a8   : > { %1699 = vrcp.f32 %v1197_v20  ;;  %v1198_v30 = vadd.f32 1.0, %v1674_v23  ;;  %v1676_v34 = vpop.eup %1675  ;;  %v1011_v37 = vpop.f32.mrf.mxu1  ;;  %v2215_v17 = vadd.f32 %v905_v28, %v552_v31 }
 0x1a9   : > { %1701 = vrcp.f32 %v1196_v25  ;;  %v2178_v38 = vpop.f32.mrf.mxu0  ;;  %v1678_v39 = vpop.eup %1677  ;;  %v1200_v41 = vadd.f32 1.0, %v1676_v34  ;;  %v1574_v58 = vmul.f32 -1.442695, %v2181_v42 }
 0x1aa   : > { %1703 = vrcp.f32 %v1198_v30  ;;  %v1199_v1 = vadd.f32 1.0, %v1678_v39  ;;  %v1014_v2 = vpop.f32.mrf.mxu1  ;;  %v2229_v31 = vadd.f32 %v2178_v38, %v557_v47 }
 0x1ab   : > { %v1680_v43 = vpop.eup %1679  ;;  %1705 = vpow2.f32 %v1564_v26  ;;  %v911_v19 = vpop.f32.mrf.mxu0  ;;  %v2200_v60 = vadd.f32 %v1014_v2, %v557_v47 }
 0x1ac   : > { %v1682_v44 = vpop.eup %1681  ;;  %v1333_v45 = vmul.f32 %v1680_v43, %v2123_v56  ;;  %1707 = vrcp.f32 %v1200_v41  ;;  %v1016_v53 = vpop.f32.mrf.mxu1 }
 0x1ad   : > { %v1684_v49 = vpop.eup %1683  ;;  %1709 = vrcp.f32 %v1199_v1  ;;  %v1201_v50 = vadd.f32 1.0, %v1682_v44  ;;  %v2195_v55 = vpop.f32.mrf.mxu0  ;;  %v1577_v15 = vmul.f32 -1.442695, %v2200_v60 }
 0x1ae   : > { %v1686_v57 = vpop.eup %1685  ;;  %v1335_v56 = vmul.f32 %v1684_v49, %v2125_v59  ;;  %1381 = vst [vmem:[%s2186_s17] sm:$0xff] %v1333_v45  ;;  %1711 = vpow2.f32 %v1571_v18  ;;  %v1017_v3 = vpop.f32.mrf.mxu1  ;;  %v1569_v59 = vmul.f32 -1.442695, %v2190_v48  ;;  %v2235_v18 = vadd.f32 %v911_v19, %v557_v47 }
 0x1af   : > { %v1688_v62 = vpop.eup %1687  ;;  %v1334_v63 = vmul.f32 %v1686_v57, %v2128_v61  ;;  %1713 = vrcp.f32 %v1201_v50  ;;  %v2209_v10 = vpop.f32.mrf.mxu0  ;;  %v1570_v61 = vmul.f32 -1.442695, %v2193_v52  ;;  %v2221_v25 = vadd.f32 %v1017_v3, %v2212_v14 }
 0x1b0   : > { %v1690_v4 = vpop.eup %1689  ;;  %1384 = vst.msk [vmem:[%s2186_s17 + $0x10] sm:$0xff] %vm1383_vm11, %v1335_v56  ;;  %v1336_v7 = vmul.f32 %v1688_v62, %v2132_v6  ;;  %1715 = vpow2.f32 %v1566_v46  ;;  %v1019_v20 = vpop.f32.mrf.mxu1  ;;  %v1575_v49 = vmul.f32 -1.442695, %v2229_v31  ;;  %v1576_v53 = vmul.f32 -1.442695, %v2235_v18 }
 0x1b1   : > { %v1692_v12 = vpop.eup %1691  ;;  %1382 = vst [vmem:[%s2186_s17 + $0x8] sm:$0xff] %v1334_v63  ;;  %v1203_v13 = vadd.f32 1.0, %v1690_v4  ;;  %1717 = vpow2.f32 %v1567_v51  ;;  %v2231_v37 = vpop.f32.mrf.mxu0  ;;  %v1580_v38 = vmul.f32 -1.442695, %v2221_v25  ;;  %v2260_v3 = vadd.f32 %v2195_v55, %v2212_v14 }
 0x1b2   : > { %v1694_v6 = vpop.eup %1693  ;;  %v1338_v23 = vmul.f32 %v1692_v12, %v2134_v9  ;;  %1385 = vst [vmem:[%s2186_s17 + $0x18] sm:$0xff] %v1336_v7  ;;  %1719 = vpow2.f32 %v1574_v58  ;;  %v1022_v30 = vpop.f32.mrf.mxu1  ;;  %v1572_v9 = vmul.f32 -1.442695, %v2207_v8 }
 0x1b3   : > { %v1696_v26 = vpop.eup %1695  ;;  %v1337_v27 = vmul.f32 %v1694_v6, %v2137_v11  ;;  %1721 = vrcp.f32 %v1203_v13  ;;  %v1573_v11 = vmul.f32 -1.442695, %v2215_v17  ;;  %v2239_v2 = vpop.permute.xlu1 %566 }
 0x1b4   : > { %v1698_v34 = vpop.eup %1697  ;;  %1387 = vst.msk [vmem:[%s2186_s17 + $0x28] sm:$0xff] %vm1383_vm11, %v1338_v23  ;;  %v1339_v28 = vmul.f32 %v1696_v26, %v2141_v16  ;;  %1723 = vpow2.f32 %v1569_v59  ;;  %v1024_v43 = vpop.f32.mrf.mxu1  ;;  %v2244_v46 = vadd.f32 %v1022_v30, %v2239_v2  ;;  %v1578_v23 = vmul.f32 -1.442695, %v2260_v3 }
 0x1b5   : > { %v1700_v39 = vpop.eup %1699  ;;  %1386 = vst [vmem:[%s2186_s17 + $0x20] sm:$0xff] %v1337_v27  ;;  %v1206_v41 = vadd.f32 1.0, %v1698_v34  ;;  %1725 = vpow2.f32 %v1570_v61  ;;  %v2250_v50 = vpop.f32.mrf.mxu0 }
 0x1b6   : > { %v1702_v1 = vpop.eup %1701  ;;  %v1341_v16 = vmul.f32 %v1700_v39, %v2143_v21  ;;  %1388 = vst [vmem:[%s2186_s17 + $0x30] sm:$0xff] %v1339_v28  ;;  %1727 = vpow2.f32 %v1577_v15  ;;  %v1025_v19 = vpop.f32.mrf.mxu1  ;;  %v1583_v63 = vmul.f32 -1.442695, %v2244_v46  ;;  %v2274_v15 = vadd.f32 %v2209_v10, %v2212_v14 }
 0x1b7   : > { %v1704_v44 = vpop.eup %1703  ;;  %v1340_v45 = vmul.f32 %v1702_v1, %v2146_v24  ;;  %1729 = vrcp.f32 %v1206_v41 }
 0x1b8   : > { %v1706_v47 = vpop.eup %1705  ;;  %1390 = vst.msk [vmem:[%s2186_s17 + $0x40] sm:$0xff] %vm1383_vm11, %v1341_v16  ;;  %v1342_v21 = vmul.f32 %v1704_v44, %v2150_v29  ;;  %1731 = vpow2.f32 %v1572_v9  ;;  %v1027_v57 = vpop.f32.mrf.mxu1  ;;  %v1579_v14 = vmul.f32 -1.442695, %v2274_v15 }
 0x1b9   : > { %v1708_v51 = vpop.eup %1707  ;;  %1389 = vst [vmem:[%s2186_s17 + $0x38] sm:$0xff] %v1340_v45  ;;  %v1202_v24 = vadd.f32 1.0, %v1706_v47  ;;  %1733 = vpow2.f32 %v1573_v11  ;;  %v572_v11 = vpop.permute.xlu0 %571 }
 0x1ba   : > { %v1710_v56 = vpop.eup %1709  ;;  %v1344_v58 = vmul.f32 %v1708_v51, %v2152_v32  ;;  %1391 = vst [vmem:[%s2186_s17 + $0x48] sm:$0xff] %v1342_v21  ;;  %1735 = vpow2.f32 %v1580_v38  ;;  %v2262_v4 = vpop.f32.mrf.mxu1  ;;  %v2282_v1 = vadd.f32 %v1025_v19, %v572_v11 }
 0x1bb   : > { %v1712_v29 = vpop.eup %1711  ;;  %v1343_v62 = vmul.f32 %v1710_v56, %v2155_v35  ;;  %1737 = vrcp.f32 %v1202_v24  ;;  %v2266_v32 = vpop.f32.mrf.mxu0  ;;  %v2289_v24 = vadd.f32 %v2231_v37, %v2239_v2 }
 0x1bc   : > { %v1714_v7 = vpop.eup %1713  ;;  %1393 = vst.msk [vmem:[%s2186_s17 + $0x58] sm:$0xff] %vm1383_vm11, %v1344_v58  ;;  %v1209_v59 = vadd.f32 1.0, %v1712_v29  ;;  %1739 = vpow2.f32 %v1575_v49  ;;  %v1032_v13 = vpop.f32.mrf.mxu1  ;;  %v1586_v57 = vmul.f32 -1.442695, %v2282_v1 }
 0x1bd   : > { %v1716_v12 = vpop.eup %1715  ;;  %1392 = vst [vmem:[%s2186_s17 + $0x50] sm:$0xff] %v1343_v62  ;;  %v1345_v35 = vmul.f32 %v1714_v7, %v2159_v40  ;;  %1741 = vpow2.f32 %v1576_v53  ;;  %v925_v30 = vpop.f32.mrf.mxu0  ;;  %v2298_v62 = vadd.f32 %v2250_v50, %v2239_v2 }
 0x1be   : > { %v1718_v61 = vpop.eup %1717  ;;  %1743 = vrcp.f32 %v1209_v59  ;;  %v1204_v55 = vadd.f32 1.0, %v1716_v12  ;;  %v2276_v26 = vpop.f32.mrf.mxu1 }
 0x1bf   : > { %v1720_v20 = vpop.eup %1719  ;;  %1394 = vst [vmem:[%s2186_s17 + $0x60] sm:$0xff] %v1345_v35  ;;  %v1205_v6 = vadd.f32 1.0, %v1718_v61  ;;  %1745 = vpow2.f32 %v1583_v63  ;;  %v929_v44 = vpop.f32.mrf.mxu0  ;;  %v1581_v61 = vmul.f32 -1.442695, %v2289_v24 }
 0x1c0   : > { %v1722_v27 = vpop.eup %1721  ;;  %1747 = vrcp.f32 %v1204_v55  ;;  %v1212_v40 = vadd.f32 1.0, %v1720_v20  ;;  %v1035_v9 = vpop.f32.mrf.mxu1  ;;  %v2306_v55 = vadd.f32 %v2266_v32, %v572_v11 }
 0x1c1   : > { %v1724_v34 = vpop.eup %1723  ;;  %v1347_v28 = vmul.f32 %v1722_v27, %v2161_v0  ;;  %1749 = vrcp.f32 %v1205_v6  ;;  %v931_v37 = vpop.f32.mrf.mxu0 }
 0x1c2   : > { %v1726_v39 = vpop.eup %1725  ;;  %1751 = vrcp.f32 %v1212_v40  ;;  %v1207_v41 = vadd.f32 1.0, %v1724_v34  ;;  %v2284_v16 = vpop.f32.mrf.mxu1 }
 0x1c3   : > { %v1728_v43 = vpop.eup %1727  ;;  %1396 = vst.msk [vmem:[%s2186_s17 + $0x70] sm:$0xff] %vm1383_vm11, %v1347_v28  ;;  %v1208_v10 = vadd.f32 1.0, %v1726_v39  ;;  %1753 = vpow2.f32 %v1578_v23  ;;  %v582_v6 = vpop.permute.xlu0 %581  ;;  %v2311_v23 = vadd.f32 %v925_v30, %v572_v11  ;;  %v1584_v30 = vmul.f32 -1.442695, %v2306_v55 }
 0x1c4   : > { %v1730_v38 = vpop.eup %1729  ;;  %1755 = vrcp.f32 %v1207_v41  ;;  %v1215_v0 = vadd.f32 1.0, %v1728_v43  ;;  %v1040_v21 = vpop.f32.mrf.mxu1  ;;  %v2315_v28 = vadd.f32 %v2276_v26, %v582_v6 }
 0x1c5   : > { %v1732_v45 = vpop.eup %1731  ;;  %v1350_v47 = vmul.f32 %v1730_v38, %v2165_v54  ;;  %1757 = vrcp.f32 %v1208_v10  ;;  %v577_v54 = vpop.permute.xlu1 %576 }
 0x1c6   : > { %v1734_v49 = vpop.eup %1733  ;;  %1759 = vrcp.f32 %v1215_v0  ;;  %v1210_v51 = vadd.f32 1.0, %v1732_v45  ;;  %v2294_v56 = vpop.f32.mrf.mxu1  ;;  %v2302_v59 = vadd.f32 %v2262_v4, %v577_v54  ;;  %v1582_v4 = vmul.f32 -1.442695, %v2298_v62 }
 0x1c7   : > { %v1736_v19 = vpop.eup %1735  ;;  %1399 = vst.msk [vmem:[%s2186_s17 + $0x88] sm:$0xff] %vm1383_vm11, %v1350_v47  ;;  %v1211_v53 = vadd.f32 1.0, %v1734_v49  ;;  %1761 = vpow2.f32 %v1579_v14  ;;  %v933_v27 = vpop.f32.mrf.mxu0  ;;  %v2321_v39 = vadd.f32 %v929_v44, %v577_v54  ;;  %v1585_v14 = vmul.f32 -1.442695, %v2311_v23 }
 0x1c8   : > { %v1738_v58 = vpop.eup %1737  ;;  %1763 = vrcp.f32 %v1210_v51  ;;  %v1218_v29 = vadd.f32 1.0, %v1736_v19  ;;  %v1043_v12 = vpop.f32.mrf.mxu1  ;;  %v1589_v34 = vmul.f32 -1.442695, %v2302_v59  ;;  %v2338_v49 = vadd.f32 %v933_v27, %v582_v6 }
 0x1c9   : > { %v1740_v63 = vpop.eup %1739  ;;  %v1346_v7 = vmul.f32 %v1738_v58, %v2168_v5  ;;  %1765 = vrcp.f32 %v1211_v53  ;;  %v587_v10 = vpop.permute.xlu1 %586  ;;  %v1587_v21 = vmul.f32 -1.442695, %v2321_v39 }
 0x1ca   : > { %v1742_v35 = vpop.eup %1741  ;;  %1767 = vrcp.f32 %v1218_v29  ;;  %v1213_v13 = vadd.f32 1.0, %v1740_v63  ;;  %v935_v38 = vpop.f32.mrf.mxu0  ;;  %v2332_v45 = vadd.f32 %v2284_v16, %v587_v10  ;;  %v1590_v12 = vmul.f32 -1.442695, %v2338_v49 }
 0x1cb   : > { %v1744_v20 = vpop.eup %1743  ;;  %1395 = vst [vmem:[%s2186_s17 + $0x68] sm:$0xff] %v1346_v7  ;;  %v1214_v2 = vadd.f32 1.0, %v1742_v35  ;;  %1769 = vpow2.f32 %v1586_v57  ;;  %v2343_v57 = vpop.permute.xlu0 %591  ;;  %v2346_v58 = vadd.f32 %v935_v38, %v582_v6 }
 0x1cc   : > { %v1746_v50 = vpop.eup %1745  ;;  %v1353_v5 = vmul.f32 %v1744_v20, %v2170_v22  ;;  %1771 = vrcp.f32 %v1213_v13  ;;  %v2352_v63 = vadd.f32 %v2294_v56, %v2343_v57 }
 0x1cd   : > { %v1748_v40 = vpop.eup %1747  ;;  %1773 = vrcp.f32 %v1214_v2  ;;  %v1221_v32 = vadd.f32 1.0, %v1746_v50  ;;  %v1591_v2 = vmul.f32 -1.442695, %v2346_v58 }
 0x1ce   : > { %v1750_v9 = vpop.eup %1749  ;;  %1402 = vst.msk [vmem:[%s2186_s17 + $0xa0] sm:$0xff] %vm1383_vm11, %v1353_v5  ;;  %v1348_v22 = vmul.f32 %v1748_v40, %v2174_v33  ;;  %1775 = vpow2.f32 %v1581_v61  ;;  %v2327_v33 = vadd.f32 %v931_v37, %v577_v54  ;;  %v939_v54 = vpop.f32.mrf.mxu0  ;;  %v1598_v6 = vmul.f32 -1.442695, %v2352_v63 }
 0x1cf   : > { %v1752_v41 = vpop.eup %1751  ;;  %v1349_v11 = vmul.f32 %v1750_v9, %v2176_v36  ;;  %1777 = vrcp.f32 %v1221_v32  ;;  %v1592_v36 = vmul.f32 -1.442695, %v2315_v28  ;;  %v2359_v61 = vadd.f32 %v939_v54, %v587_v10 }
 0x1d0   : > { %v1754_v43 = vpop.eup %1753  ;;  %1397 = vst [vmem:[%s2186_s17 + $0x78] sm:$0xff] %v1348_v22  ;;  %v1356_v26 = vmul.f32 %v1752_v41, %v2181_v42  ;;  %1779 = vpow2.f32 %v1582_v4  ;;  %v941_v50 = vpop.f32.mrf.mxu0 }
 0x1d1   : > { %v1756_v0 = vpop.eup %1755  ;;  %1398 = vst [vmem:[%s2186_s17 + $0x80] sm:$0xff] %v1349_v11  ;;  %v1216_v44 = vadd.f32 1.0, %v1754_v43  ;;  %1781 = vpow2.f32 %v1589_v34  ;;  %v1593_v40 = vmul.f32 -1.442695, %v2359_v61  ;;  %v2371_v32 = vadd.f32 %v941_v50, %v587_v10 }
 0x1d2   : > { %v1758_v47 = vpop.eup %1757  ;;  %1405 = vst.msk [vmem:[%s2186_s17 + $0xb8] sm:$0xff] %vm1383_vm11, %v1356_v26  ;;  %v1351_v42 = vmul.f32 %v1756_v0, %v2190_v48  ;;  %1783 = vpow2.f32 %v1584_v30  ;;  %v1588_v48 = vmul.f32 -1.442695, %v2327_v33  ;;  %v943_v22 = vpop.f32.mrf.mxu0 }
 0x1d3   : > { %v1760_v51 = vpop.eup %1759  ;;  %v1352_v19 = vmul.f32 %v1758_v47, %v2193_v52  ;;  %1785 = vrcp.f32 %v1216_v44  ;;  %v1595_v52 = vmul.f32 -1.442695, %v2332_v45  ;;  %v1594_v26 = vmul.f32 -1.442695, %v2371_v32 }
 0x1d4   : > { %v1762_v53 = vpop.eup %1761  ;;  %1400 = vst [vmem:[%s2186_s17 + $0x90] sm:$0xff] %v1351_v42  ;;  %v1359_v16 = vmul.f32 %v1760_v51, %v2200_v60  ;;  %1787 = vpow2.f32 %v1585_v14  ;;  %v2380_v10 = vadd.f32 %v943_v22, %v2343_v57  ;;  %v945_v0 = vpop.f32.mrf.mxu0 }
 0x1d5   : > { %v1764_v29 = vpop.eup %1763  ;;  %1401 = vst [vmem:[%s2186_s17 + $0x98] sm:$0xff] %v1352_v19  ;;  %v1217_v37 = vadd.f32 1.0, %v1762_v53  ;;  %1789 = vpow2.f32 %v1592_v36  ;;  %v2386_v19 = vadd.f32 %v945_v0, %v2343_v57 }
 0x1d6   : > { %v1766_v60 = vpop.eup %1765  ;;  %1408 = vst.msk [vmem:[%s2186_s17 + $0xd0] sm:$0xff] %vm1383_vm11, %v1359_v16  ;;  %v1354_v7 = vmul.f32 %v1764_v29, %v2207_v8  ;;  %1791 = vpow2.f32 %v1587_v21  ;;  %v1596_v51 = vmul.f32 -1.442695, %v2380_v10 }
 0x1d7   : > { %v1768_v35 = vpop.eup %1767  ;;  %v1355_v13 = vmul.f32 %v1766_v60, %v2215_v17  ;;  %1793 = vrcp.f32 %v1217_v37  ;;  %v1597_v60 = vmul.f32 -1.442695, %v2386_v19 }
 0x1d8   : > { %v1770_v20 = vpop.eup %1769  ;;  %1403 = vst [vmem:[%s2186_s17 + $0xa8] sm:$0xff] %v1354_v7  ;;  %v1362_v56 = vmul.f32 %v1768_v35, %v2221_v25  ;;  %1795 = vpow2.f32 %v1588_v48 }
 0x1d9   : > { %v1772_v8 = vpop.eup %1771  ;;  %1404 = vst [vmem:[%s2186_s17 + $0xb0] sm:$0xff] %v1355_v13  ;;  %v1224_v5 = vadd.f32 1.0, %v1770_v20  ;;  %1797 = vpow2.f32 %v1595_v52 }
 0x1da   : > { %v1774_v17 = vpop.eup %1773  ;;  %1411 = vst.msk [vmem:[%s2186_s17 + $0xe8] sm:$0xff] %vm1383_vm11, %v1362_v56  ;;  %v1357_v4 = vmul.f32 %v1772_v8, %v2229_v31  ;;  %1799 = vpow2.f32 %v1590_v12 }
 0x1db   : > { %v1776_v27 = vpop.eup %1775  ;;  %v1358_v25 = vmul.f32 %v1774_v17, %v2235_v18  ;;  %1801 = vrcp.f32 %v1224_v5 }
 0x1dc   : > { %v1778_v34 = vpop.eup %1777  ;;  %1406 = vst [vmem:[%s2186_s17 + $0xc0] sm:$0xff] %v1357_v4  ;;  %v1219_v9 = vadd.f32 1.0, %v1776_v27  ;;  %1803 = vpow2.f32 %v1591_v2 }
 0x1dd   : > { %v1780_v30 = vpop.eup %1779  ;;  %1407 = vst [vmem:[%s2186_s17 + $0xc8] sm:$0xff] %v1358_v25  ;;  %v1365_v41 = vmul.f32 %v1778_v34, %v2244_v46  ;;  %1805 = vpow2.f32 %v1598_v6 }
 0x1de   : > { %v1782_v31 = vpop.eup %1781  ;;  %1807 = vrcp.f32 %v1219_v9  ;;  %v1220_v11 = vadd.f32 1.0, %v1780_v30 }
 0x1df   : > { %v1784_v18 = vpop.eup %1783  ;;  %1414 = vst.msk [vmem:[%s2186_s17 + $0x100] sm:$0xff] %vm1383_vm11, %v1365_v41  ;;  %v1227_v43 = vadd.f32 1.0, %v1782_v31  ;;  %1809 = vpow2.f32 %v1593_v40 }
 0x1e0   : > { %v1786_v14 = vpop.eup %1785  ;;  %1811 = vrcp.f32 %v1220_v11  ;;  %v1222_v38 = vadd.f32 1.0, %v1784_v18 }
 0x1e1   : > { %v1788_v46 = vpop.eup %1787  ;;  %v1360_v44 = vmul.f32 %v1786_v14, %v2260_v3  ;;  %1813 = vrcp.f32 %v1227_v43 }
 0x1e2   : > { %v1790_v36 = vpop.eup %1789  ;;  %1815 = vrcp.f32 %v1222_v38  ;;  %v1223_v47 = vadd.f32 1.0, %v1788_v46 }
 0x1e3   : > { %v1792_v42 = vpop.eup %1791  ;;  %1409 = vst [vmem:[%s2186_s17 + $0xd8] sm:$0xff] %v1360_v44  ;;  %v1230_v21 = vadd.f32 1.0, %v1790_v36  ;;  %1817 = vpow2.f32 %v1594_v26 }
 0x1e4   : > { %v1794_v53 = vpop.eup %1793  ;;  %1819 = vrcp.f32 %v1223_v47  ;;  %v1225_v16 = vadd.f32 1.0, %v1792_v42 }
 0x1e5   : > { %v1796_v48 = vpop.eup %1795  ;;  %v1361_v3 = vmul.f32 %v1794_v53, %v2274_v15  ;;  %1821 = vrcp.f32 %v1230_v21 }
 0x1e6   : > { %v1798_v54 = vpop.eup %1797  ;;  %1823 = vrcp.f32 %v1225_v16  ;;  %v1226_v29 = vadd.f32 1.0, %v1796_v48 }
 0x1e7   : > { %v1800_v37 = vpop.eup %1799  ;;  %1410 = vst [vmem:[%s2186_s17 + $0xe0] sm:$0xff] %v1361_v3  ;;  %v1233_v52 = vadd.f32 1.0, %v1798_v54  ;;  %1825 = vpow2.f32 %v1596_v51 }
 0x1e8   : > { %v1802_v7 = vpop.eup %1801  ;;  %1827 = vrcp.f32 %v1226_v29  ;;  %v1228_v57 = vadd.f32 1.0, %v1800_v37 }
 0x1e9   : > { %v1804_v12 = vpop.eup %1803  ;;  %v1368_v35 = vmul.f32 %v1802_v7, %v2282_v1  ;;  %1829 = vrcp.f32 %v1233_v52 }
 0x1ea   : > { %v1806_v15 = vpop.eup %1805  ;;  %1831 = vrcp.f32 %v1228_v57  ;;  %v1229_v13 = vadd.f32 1.0, %v1804_v12 }
 0x1eb   : > { %v1808_v20 = vpop.eup %1807  ;;  %1417 = vst.msk [vmem:[%s2186_s17 + $0x118] sm:$0xff] %vm1383_vm11, %v1368_v35  ;;  %v1236_v56 = vadd.f32 1.0, %v1806_v15  ;;  %1833 = vpow2.f32 %v1597_v60 }
 0x1ec   : > { %v1810_v2 = vpop.eup %1809  ;;  %v1363_v50 = vmul.f32 %v1808_v20, %v2289_v24  ;;  %1835 = vrcp.f32 %v1229_v13 }
 0x1ed   : > { %v1812_v8 = vpop.eup %1811  ;;  %1837 = vrcp.f32 %v1236_v56  ;;  %v1231_v1 = vadd.f32 1.0, %v1810_v2 }
 0x1ee   : > { %v1814_v5 = vpop.eup %1813  ;;  %1412 = vst [vmem:[%s2186_s17 + $0xf0] sm:$0xff] %v1363_v50  ;;  %v1364_v6 = vmul.f32 %v1812_v8, %v2298_v62 }
 0x1ef   : > { %v1816_v17 = vpop.eup %1815  ;;  %v1371_v4 = vmul.f32 %v1814_v5, %v2302_v59  ;;  %1839 = vrcp.f32 %v1231_v1 }
 0x1f0   : > { %v1818_v27 = vpop.eup %1817  ;;  %1413 = vst [vmem:[%s2186_s17 + $0xf8] sm:$0xff] %v1364_v6  ;;  %v1366_v25 = vmul.f32 %v1816_v17, %v2306_v55 }
 0x1f1   : > { %v1820_v24 = vpop.eup %1819  ;;  %1420 = vst.msk [vmem:[%s2186_s17 + $0x130] sm:$0xff] %vm1383_vm11, %v1371_v4  ;;  %v1232_v40 = vadd.f32 1.0, %v1818_v27 }
 0x1f2   : > { %v1822_v34 = vpop.eup %1821  ;;  %1415 = vst [vmem:[%s2186_s17 + $0x108] sm:$0xff] %v1366_v25  ;;  %v1367_v9 = vmul.f32 %v1820_v24, %v2311_v23 }
 0x1f3   : > { %v1824_v62 = vpop.eup %1823  ;;  %v1374_v22 = vmul.f32 %v1822_v34, %v2315_v28  ;;  %1841 = vrcp.f32 %v1232_v40 }
 0x1f4   : > { %v1826_v59 = vpop.eup %1825  ;;  %1416 = vst [vmem:[%s2186_s17 + $0x110] sm:$0xff] %v1367_v9  ;;  %v1369_v30 = vmul.f32 %v1824_v62, %v2321_v39 }
 0x1f5   : > { %v1828_v55 = vpop.eup %1827  ;;  %1423 = vst.msk [vmem:[%s2186_s17 + $0x148] sm:$0xff] %vm1383_vm11, %v1374_v22  ;;  %v1234_v41 = vadd.f32 1.0, %v1826_v59 }
 0x1f6   : > { %v1830_v31 = vpop.eup %1829  ;;  %1418 = vst [vmem:[%s2186_s17 + $0x120] sm:$0xff] %v1369_v30  ;;  %v1370_v11 = vmul.f32 %v1828_v55, %v2327_v33 }
 0x1f7   : > { %v1832_v23 = vpop.eup %1831  ;;  %v1377_v28 = vmul.f32 %v1830_v31, %v2332_v45  ;;  %1843 = vrcp.f32 %v1234_v41 }
 0x1f8   : > { %v1834_v18 = vpop.eup %1833  ;;  %1419 = vst [vmem:[%s2186_s17 + $0x128] sm:$0xff] %v1370_v11  ;;  %v1372_v39 = vmul.f32 %v1832_v23, %v2338_v49 }
 0x1f9   : > { %v1836_v43 = vpop.eup %1835  ;;  %1426 = vst.msk [vmem:[%s2186_s17 + $0x160] sm:$0xff] %vm1383_vm11, %v1377_v28  ;;  %v1235_v26 = vadd.f32 1.0, %v1834_v18 }
 0x1fa   : > { %v1838_v14 = vpop.eup %1837  ;;  %1421 = vst [vmem:[%s2186_s17 + $0x138] sm:$0xff] %v1372_v39  ;;  %v1373_v33 = vmul.f32 %v1836_v43, %v2346_v58 }
 0x1fb   : > { %v1380_v38 = vmul.f32 %v1838_v14, %v2352_v63  ;;  %1845 = vrcp.f32 %v1235_v26 }
 0x1fc   : > { %v1840_v45 = vpop.eup %1839  ;;  %1422 = vst [vmem:[%s2186_s17 + $0x140] sm:$0xff] %v1373_v33 }
 0x1fd   : > { %1429 = vst.msk [vmem:[%s2186_s17 + $0x178] sm:$0xff] %vm1383_vm11, %v1380_v38  ;;  %v1375_v49 = vmul.f32 %v1840_v45, %v2359_v61 }
 0x1ff   : > { %1424 = vst [vmem:[%s2186_s17 + $0x150] sm:$0xff] %v1375_v49 }
 0x200   : > { %v1842_v0 = vpop.eup %1841 }
 0x201   : > { %v1376_v46 = vmul.f32 %v1842_v0, %v2371_v32 }
 0x203   : > { %1425 = vst [vmem:[%s2186_s17 + $0x158] sm:$0xff] %v1376_v46 }
 0x204   : > { %v1844_v44 = vpop.eup %1843 }
 0x205   : > { %v1378_v36 = vmul.f32 %v1844_v44, %v2380_v10 }
 0x207   : > { %1427 = vst [vmem:[%s2186_s17 + $0x168] sm:$0xff] %v1378_v36 }
 0x208   : > { %v1846_v58 = vpop.eup %1845 }
 0x209   : > { %v1379_v47 = vmul.f32 %v1846_v58, %v2386_v19 }
 0x20b   : > { %1428 = vst [vmem:[%s2186_s17 + $0x170] sm:$0xff] %v1379_v47 }
 0x20c PF: > { %s13_s12 = sadd.s32 1, %s1853_s12  }
 0x20d   : > { %p10_p4 = scmp.ge.s32.totalorder %s13_s12, 4  }
 0x20f   :  { %12 = sbr.rel (!%p10_p4) target bundleno = 1 (0x1), region = 62 }

</bundles_post_ra>
